<compile_context>
chip_gen: v5e
topology: v5e:2x2
jax: 0.10.0
libtpu: 0.0.40
codegen_flags: <defaults>
</compile_context>

<pallas_src>
import numpy as np
import jax
import jax.numpy as jnp
from jax.experimental import pallas as pl
from jax.experimental.pallas import tpu as pltpu


def _round_up(n, m):
    return ((n + m - 1) // m) * m


# -----------------------------------------------------------------------------
# Parameter construction (mirrors torch.nn.Linear default init). Done once.
# -----------------------------------------------------------------------------
def init_sampler_params(input_size, hidden_size, output_size, *, k=2, seed=0):
    """The k MLPs of Sampler.to_parameters (isotropic_gaussian -> k=2)."""
    key = jax.random.PRNGKey(seed)
    params = []
    for _ in range(k):
        key, k1, k2, k3, k4 = jax.random.split(key, 5)
        b_in = 1.0 / float(np.sqrt(input_size))
        b_hid = 1.0 / float(np.sqrt(hidden_size))
        params.append(dict(
            W1=jax.random.uniform(k1, (hidden_size, input_size), jnp.float32, -b_in, b_in),
            b1=jax.random.uniform(k2, (hidden_size,), jnp.float32, -b_in, b_in),
            W2=jax.random.uniform(k3, (output_size, hidden_size), jnp.float32, -b_hid, b_hid),
            b2=jax.random.uniform(k4, (output_size,), jnp.float32, -b_hid, b_hid),
        ))
    return params


def pack_sampler_params(params, input_size, hidden_size, output_size, *,
                        dtype=jnp.bfloat16, w2_layout="auto"):
    """Pre-transpose / concatenate / pad the k MLPs' weights ONCE.

    Returns lane-dense, (8,128)-aligned fused weights:
      W1: (Ip, k*Hp)                     first layers of all heads, side by side
      W2: (k*Hp, k*Op) block-diagonal    when Hp = Op = 128 ("blockdiag")
          (k, Hp, Op)  per-head          when heads are larger ("perhead")
      b1: (1, k*Hp), b2: (1, k*Op)       biases kept in float32
    """
    k = len(params)
    Ip = _round_up(input_size, 128)
    Hp = _round_up(hidden_size, 128)
    Op = _round_up(output_size, 128)

    if w2_layout == "auto":
        # Fused block-diagonal only pays off when each head fits one 128-wide
        # MXU tile; beyond that the zero half wastes MXU cycles and VMEM.
        w2_layout = "blockdiag" if (Hp <= 128 and Op <= 128) else "perhead"
    assert w2_layout in ("blockdiag", "perhead")

    w1cat = np.zeros((Ip, k * Hp), np.float32)
    b1cat = np.zeros((1, k * Hp), np.float32)
    b2cat = np.zeros((1, k * Op), np.float32)
    if w2_layout == "blockdiag":
        w2 = np.zeros((k * Hp, k * Op), np.float32)
    else:
        w2 = np.zeros((k, Hp, Op), np.float32)

    for j, p in enumerate(params):
        w1cat[:input_size, j * Hp:j * Hp + hidden_size] = np.asarray(p["W1"]).T
        b1cat[0, j * Hp:j * Hp + hidden_size] = np.asarray(p["b1"])
        b2cat[0, j * Op:j * Op + output_size] = np.asarray(p["b2"])
        if w2_layout == "blockdiag":
            w2[j * Hp:j * Hp + hidden_size, j * Op:j * Op + output_size] = np.asarray(p["W2"]).T
        else:
            w2[j, :hidden_size, :output_size] = np.asarray(p["W2"]).T

    return dict(
        k=k, input_size=input_size, output_size=output_size,
        Ip=Ip, Hp=Hp, Op=Op, dtype=dtype, w2_layout=w2_layout,
        W1=jnp.asarray(w1cat, dtype),
        b1=jnp.asarray(b1cat, jnp.float32),
        W2=jnp.asarray(w2, dtype),
        b2=jnp.asarray(b2cat, jnp.float32),
    )


# -----------------------------------------------------------------------------
# Pallas kernel: fused two-layer MLP for all k heads at once.
# -----------------------------------------------------------------------------
def _sampler_mlp_kernel(x_ref, w1_ref, b1_ref, w2_ref, b2_ref, out_ref):
    tb, k, Op = out_ref.shape
    Hp = w1_ref.shape[1] // k

    # Cast the activation tile to the weight dtype inside the kernel (keeps the
    # wrapper free of an extra HBM cast pass; bf16 weights -> bf16 MXU path).
    xv = x_ref[...].astype(w1_ref.dtype)

    # Layer 1 of all k heads in ONE MXU matmul: (tb, Ip) @ (Ip, k*Hp).
    # f32 accumulation; bias add + tanh stay f32 (v5e's VPU/EUP are f32-only).
    h = jnp.tanh(
        jnp.dot(xv, w1_ref[...], preferred_element_type=jnp.float32) + b1_ref[...]
    )
    hc = h.astype(w2_ref.dtype)

    if len(w2_ref.shape) == 3:
        # Per-head W2 (k, Hp, Op): k dots, no zero-padded block-diagonal.
        for j in range(k):
            oj = (jnp.dot(hc[:, j * Hp:(j + 1) * Hp], w2_ref[j],
                          preferred_element_type=jnp.float32)
                  + b2_ref[:, j * Op:(j + 1) * Op])
            out_ref[:, j, :] = oj.astype(out_ref.dtype)
    else:
        # Fused block-diagonal W2 (k*Hp, k*Op): one matmul for all heads.
        o = (jnp.dot(hc, w2_ref[...], preferred_element_type=jnp.float32)
             + b2_ref[...])
        for j in range(k):
            out_ref[:, j, :] = o[:, j * Op:(j + 1) * Op].astype(out_ref.dtype)


# -----------------------------------------------------------------------------
# Wrapper
# -----------------------------------------------------------------------------
def _pick_batch_tile(Bp, batch_tile):
    """Largest multiple of 8 <= batch_tile that divides Bp, preferring a grid
    of >= 2 steps (so the 'parallel' axis can shard across v7x's 2 TCs)."""
    cap = max(8, _round_up(min(batch_tile, Bp), 8))
    min_steps = 2 if Bp >= 16 else 1
    best = 8
    for t in range(8, cap + 1, 8):
        if Bp % t == 0 and Bp // t >= min_steps:
            best = t
    return best


def _vmem_limit_bytes(weight_arrays, tb, Ip, k, Op, x_dtype):
    """Footprint-derived scoped-VMEM limit, clamped to ~90% of physical VMEM."""
    wbytes = sum(int(a.size) * a.dtype.itemsize for a in weight_arrays)
    tile_bytes = tb * Ip * jnp.dtype(x_dtype).itemsize + tb * k * Op * 4
    # Conservative: assume everything double-buffered + generous headroom.
    need = 2 * wbytes + 4 * tile_bytes + (8 << 20)
    try:
        cap = int(pltpu.get_tpu_info().vmem_capacity_bytes)
    except Exception:  # pragma: no cover - older JAX / no device info
        cap = 64 << 20  # v7x-safe fallback
    return int(min(max(need, 32 << 20), int(cap * 0.9)))


def sampler_forward(packed, x, *, batch_tile=512):
    """Sampler.forward: returns [params_0, params_1] (mean / log-variance heads)."""
    B, I = x.shape
    assert I == packed["input_size"]
    k, Ip, Hp, Op = packed["k"], packed["Ip"], packed["Hp"], packed["Op"]
    O = packed["output_size"]
    W1, b1, W2, b2 = packed["W1"], packed["b1"], packed["W2"], packed["b2"]

    # Batch tiling: multiple of 8, divides the 8-aligned batch, >= 2 grid steps
    # whenever the batch allows it.
    Bp = _round_up(B, 8)
    tb = _pick_batch_tile(Bp, batch_tile)
    grid = (Bp // tb,)

    # Minimal wrapper-side padding: only touch x if it is actually needed
    # (feature dim must be real zeros since it is a contraction dim; batch is
    # padded at most to the next multiple of 8). No wrapper dtype cast.
    pad_b, pad_i = Bp - B, Ip - I
    if pad_b or pad_i:
        x = jnp.pad(x, ((0, pad_b), (0, pad_i)))

    vmem_limit = _vmem_limit_bytes((W1, b1, W2, b2), tb, Ip, k, Op, x.dtype)

    def build(single_buffer_weights):
        def const_spec(shape):
            # Weights never change across the grid -> keep them resident and,
            # when supported, single-buffered (double-buffering is VMEM waste).
            kw = {}
            if single_buffer_weights:
                kw["pipeline_mode"] = pl.Buffered(1)
            return pl.BlockSpec(shape, lambda i, _s=shape: (0,) * len(_s), **kw)

        return pl.pallas_call(
            _sampler_mlp_kernel,
            out_shape=jax.ShapeDtypeStruct((Bp, k, Op), jnp.float32),
            grid=grid,
            in_specs=[
                pl.BlockSpec((tb, Ip), lambda i: (i, 0)),   # x: tiled over batch
                const_spec(W1.shape),                        # W1 resident
                const_spec(b1.shape),                        # b1
                const_spec(W2.shape),                        # W2 (blockdiag or per-head)
                const_spec(b2.shape),                        # b2
            ],
            out_specs=pl.BlockSpec((tb, k, Op), lambda i: (i, 0, 0)),
            compiler_params=pltpu.CompilerParams(
                dimension_semantics=("parallel",),
                vmem_limit_bytes=vmem_limit,
            ),
        )

    try:
        out = build(True)(x, W1, b1, W2, b2)
    except Exception:
        # Fallback for JAX versions without pipeline_mode on pallas_call specs.
        out = build(False)(x, W1, b1, W2, b2)

    # Per-head split is a major-dim slice; strip feature padding.
    return [out[:B, j, :O] for j in range(k)]


# -----------------------------------------------------------------------------
# Distribution helpers (not part of forward(); tiny elementwise + reductions,
# kept as plain JAX rather than dedicated kernels).
# -----------------------------------------------------------------------------
def sample_from_isotropic_gaussian(key, mean, log_variance):
    return mean + jnp.exp(0.5 * log_variance) * jax.random.normal(key, mean.shape)


def kl_isotropic_to_standard_gaussian(mean, log_variance):
    return -0.5 * jnp.sum(1.0 + log_variance - mean ** 2 - jnp.exp(log_variance))


def log_pdf_isotropic_gaussian(value, mean, log_variance):
    d = value - mean
    return -0.5 * jnp.sum(np.log(2.0 * np.pi) + log_variance
                          + d * jnp.exp(-log_variance) * d)


if __name__ == "__main__":
    B, I, H, O = 2, 16, 32, 32  # batch, input_size, mlp_hidden_size, output_size

    params = init_sampler_params(I, H, O, k=2, seed=0)
    x = jax.random.normal(jax.random.PRNGKey(0), (B, I), dtype=jnp.float32)

    # Pure-JAX reference.
    def reference(xi):
        ref = []
        for p in params:
            h = jnp.tanh(xi @ p["W1"].T + p["b1"])
            ref.append(h @ p["W2"].T + p["b2"])
        return ref

    ref = reference(x)

    # 1) float32 weights, fused block-diagonal layer-2 (auto at these sizes).
    packed_f32 = pack_sampler_params(params, I, H, O, dtype=jnp.float32)
    outs = jax.block_until_ready(sampler_forward(packed_f32, x))
    assert len(outs) == 2
    for o, r in zip(outs, ref):
        assert o.shape == (B, O)
        np.testing.assert_allclose(np.asarray(o), np.asarray(r), rtol=1e-5, atol=1e-5)

    # 2) float32 weights, per-head layer-2 path (forced) — same tight tolerance.
    packed_ph = pack_sampler_params(params, I, H, O, dtype=jnp.float32,
                                    w2_layout="perhead")
    outs_ph = jax.block_until_ready(sampler_forward(packed_ph, x))
    for o, r in zip(outs_ph, ref):
        np.testing.assert_allclose(np.asarray(o), np.asarray(r), rtol=1e-5, atol=1e-5)

    # 3) default bf16 packing (native MXU path on v6e/v7x): looser tolerance.
    packed_bf16 = pack_sampler_params(params, I, H, O)
    outs_bf16 = jax.block_until_ready(sampler_forward(packed_bf16, x))
    for o, r in zip(outs_bf16, ref):
        np.testing.assert_allclose(np.asarray(o), np.asarray(r), rtol=5e-2, atol=5e-2)

    # 4) multi-step grid + batch/feature padding path (B not a multiple of 8).
    B2 = 20
    x2 = jax.random.normal(jax.random.PRNGKey(2), (B2, I), dtype=jnp.float32)
    outs2 = jax.block_until_ready(sampler_forward(packed_f32, x2, batch_tile=8))
    for o, r in zip(outs2, reference(x2)):
        assert o.shape == (B2, O)
        np.testing.assert_allclose(np.asarray(o), np.asarray(r), rtol=1e-5, atol=1e-5)

    # Exercise the Sampler's sample / kl / log_pdf helpers once (plain JAX).
    mean, logvar = outs
    s = sample_from_isotropic_gaussian(jax.random.PRNGKey(1), mean, logvar)
    _ = kl_isotropic_to_standard_gaussian(mean, logvar)
    _ = log_pdf_isotropic_gaussian(s, mean, logvar)
    jax.block_until_ready(s)

    print("KERNEL_OK")
</pallas_src>

<mosaic_0001>
module attributes {stable_mosaic.version = 11 : i64} {
  func.func @_sampler_mlp_kernel(%arg0: i32, %arg1: memref<8x128xf32, #tpu.memory_space<vmem>>, %arg2: memref<128x256xf32, #tpu.memory_space<vmem>>, %arg3: memref<1x256xf32, #tpu.memory_space<vmem>>, %arg4: memref<256x256xf32, #tpu.memory_space<vmem>>, %arg5: memref<1x256xf32, #tpu.memory_space<vmem>>, %arg6: memref<8x2x128xf32, #tpu.memory_space<vmem>>) attributes {dimension_semantics = [#tpu.dimension_semantics<parallel>], iteration_bounds = array<i64: 1>, scalar_prefetch = 0 : i64, scratch_operands = 0 : i64, tpu.core_type = #tpu.core_type<tc>, window_params = [{transform_indices = @transform_0, window_bounds = array<i64: 8, 128>}, {pipeline_mode = #tpu.pipeline_mode<synchronous>, transform_indices = @transform_1, window_bounds = array<i64: 128, 256>}, {pipeline_mode = #tpu.pipeline_mode<synchronous>, transform_indices = @transform_2, window_bounds = array<i64: 1, 256>}, {pipeline_mode = #tpu.pipeline_mode<synchronous>, transform_indices = @transform_3, window_bounds = array<i64: 256, 256>}, {pipeline_mode = #tpu.pipeline_mode<synchronous>, transform_indices = @transform_4, window_bounds = array<i64: 1, 256>}, {transform_indices = @transform_5, window_bounds = array<i64: 8, 2, 128>}]} {
    %c0 = arith.constant 0 : index
    %c0_0 = arith.constant 0 : index
    %0 = vector.load %arg1[%c0, %c0_0] : memref<8x128xf32, #tpu.memory_space<vmem>>, vector<8x128xf32>
    %c0_1 = arith.constant 0 : index
    %c0_2 = arith.constant 0 : index
    %1 = vector.load %arg2[%c0_1, %c0_2] : memref<128x256xf32, #tpu.memory_space<vmem>>, vector<128x256xf32>
    %cst = arith.constant dense<0.000000e+00> : vector<8x256xf32>
    %2 = tpu.matmul %0, %1, %cst {dimension_numbers = #tpu.dot_dimension_numbers<[1], [0], [0], [1], [0, 0, 1, 1], [], []>} : vector<8x128xf32>, vector<128x256xf32>, vector<8x256xf32> -> vector<8x256xf32>
    %c0_3 = arith.constant 0 : index
    %c0_4 = arith.constant 0 : index
    %3 = vector.load %arg3[%c0_3, %c0_4] : memref<1x256xf32, #tpu.memory_space<vmem>>, vector<1x256xf32>
    %4 = vector.broadcast %3 : vector<1x256xf32> to vector<8x256xf32>
    %5 = arith.addf %2, %4 : vector<8x256xf32>
    %6 = math.tanh %5 : vector<8x256xf32>
    %c0_5 = arith.constant 0 : index
    %c0_6 = arith.constant 0 : index
    %7 = vector.load %arg4[%c0_5, %c0_6] : memref<256x256xf32, #tpu.memory_space<vmem>>, vector<256x256xf32>
    %cst_7 = arith.constant dense<0.000000e+00> : vector<8x256xf32>
    %8 = tpu.matmul %6, %7, %cst_7 {dimension_numbers = #tpu.dot_dimension_numbers<[1], [0], [0], [1], [0, 0, 1, 1], [], []>} : vector<8x256xf32>, vector<256x256xf32>, vector<8x256xf32> -> vector<8x256xf32>
    %c0_8 = arith.constant 0 : index
    %c0_9 = arith.constant 0 : index
    %9 = vector.load %arg5[%c0_8, %c0_9] : memref<1x256xf32, #tpu.memory_space<vmem>>, vector<1x256xf32>
    %10 = vector.broadcast %9 : vector<1x256xf32> to vector<8x256xf32>
    %11 = arith.addf %8, %10 : vector<8x256xf32>
    %12 = vector.extract_strided_slice %11 {offsets = [0, 0], sizes = [8, 128], strides = [1, 1]} : vector<8x256xf32> to vector<8x128xf32>
    %c0_10 = arith.constant 0 : index
    %c0_11 = arith.constant 0 : index
    %c0_12 = arith.constant 0 : index
    %13 = vector.load %arg6[%c0_10, %c0_11, %c0_12] : memref<8x2x128xf32, #tpu.memory_space<vmem>>, vector<8x1x128xf32>
    %14 = vector.shape_cast %13 : vector<8x1x128xf32> to vector<8x128xf32>
    %15 = vector.shape_cast %12 : vector<8x128xf32> to vector<8x1x128xf32>
    tpu.vector_store %arg6[%c0_10, %c0_11, %c0_12], %15 {strides = array<i32>} : memref<8x2x128xf32, #tpu.memory_space<vmem>>, vector<8x1x128xf32>,
    %16 = vector.extract_strided_slice %11 {offsets = [0, 128], sizes = [8, 128], strides = [1, 1]} : vector<8x256xf32> to vector<8x128xf32>
    %c0_13 = arith.constant 0 : index
    %c1 = arith.constant 1 : index
    %c0_14 = arith.constant 0 : index
    %17 = vector.load %arg6[%c0_13, %c1, %c0_14] : memref<8x2x128xf32, #tpu.memory_space<vmem>>, vector<8x1x128xf32>
    %18 = vector.shape_cast %17 : vector<8x1x128xf32> to vector<8x128xf32>
    %19 = vector.shape_cast %16 : vector<8x128xf32> to vector<8x1x128xf32>
    tpu.vector_store %arg6[%c0_13, %c1, %c0_14], %19 {strides = array<i32>} : memref<8x2x128xf32, #tpu.memory_space<vmem>>, vector<8x1x128xf32>,
    return
  }
  func.func @transform_0(%arg0: i32) -> (i32, i32) {
    %c0_i32 = arith.constant 0 : i32
    %c0_i32_0 = arith.constant 0 : i32
    return %arg0, %c0_i32 : i32, i32
  }
  func.func @transform_1(%arg0: i32) -> (i32, i32) {
    %c0_i32 = arith.constant 0 : i32
    %c0_i32_0 = arith.constant 0 : i32
    %c0_i32_1 = arith.constant 0 : i32
    return %c0_i32, %c0_i32_0 : i32, i32
  }
  func.func @transform_2(%arg0: i32) -> (i32, i32) {
    %c0_i32 = arith.constant 0 : i32
    %c0_i32_0 = arith.constant 0 : i32
    %c0_i32_1 = arith.constant 0 : i32
    return %c0_i32, %c0_i32_0 : i32, i32
  }
  func.func @transform_3(%arg0: i32) -> (i32, i32) {
    %c0_i32 = arith.constant 0 : i32
    %c0_i32_0 = arith.constant 0 : i32
    %c0_i32_1 = arith.constant 0 : i32
    return %c0_i32, %c0_i32_0 : i32, i32
  }
  func.func @transform_4(%arg0: i32) -> (i32, i32) {
    %c0_i32 = arith.constant 0 : i32
    %c0_i32_0 = arith.constant 0 : i32
    %c0_i32_1 = arith.constant 0 : i32
    return %c0_i32, %c0_i32_0 : i32, i32
  }
  func.func @transform_5(%arg0: i32) -> (i32, i32, i32) {
    %c0_i32 = arith.constant 0 : i32
    %c0_i32_0 = arith.constant 0 : i32
    %c0_i32_1 = arith.constant 0 : i32
    return %arg0, %c0_i32, %c0_i32_0 : i32, i32, i32
  }
}

module attributes {stable_mosaic.version = 11 : i64} {
  func.func @_sampler_mlp_kernel(%arg0: i32, %arg1: memref<8x128xf32, #tpu.memory_space<vmem>>, %arg2: memref<128x256xf32, #tpu.memory_space<vmem>>, %arg3: memref<1x256xf32, #tpu.memory_space<vmem>>, %arg4: memref<256x256xf32, #tpu.memory_space<vmem>>, %arg5: memref<1x256xf32, #tpu.memory_space<vmem>>, %arg6: memref<8x2x128xf32, #tpu.memory_space<vmem>>) attributes {dimension_semantics = [#tpu.dimension_semantics<parallel>], iteration_bounds = array<i64: 1>, scalar_prefetch = 0 : i64, scratch_operands = 0 : i64, tpu.core_type = #tpu.core_type<tc>, window_params = [{transform_indices = @transform_0, window_bounds = array<i64: 8, 128>}, {pipeline_mode = #tpu.pipeline_mode<synchronous>, transform_indices = @transform_1, window_bounds = array<i64: 128, 256>}, {pipeline_mode = #tpu.pipeline_mode<synchronous>, transform_indices = @transform_2, window_bounds = array<i64: 1, 256>}, {pipeline_mode = #tpu.pipeline_mode<synchronous>, transform_indices = @transform_3, window_bounds = array<i64: 256, 256>}, {pipeline_mode = #tpu.pipeline_mode<synchronous>, transform_indices = @transform_4, window_bounds = array<i64: 1, 256>}, {transform_indices = @transform_5, window_bounds = array<i64: 8, 2, 128>}]} {
    %c0 = arith.constant 0 : index
    %c0_0 = arith.constant 0 : index
    %0 = vector.load %arg1[%c0, %c0_0] : memref<8x128xf32, #tpu.memory_space<vmem>>, vector<8x128xf32>
    %c0_1 = arith.constant 0 : index
    %c0_2 = arith.constant 0 : index
    %1 = vector.load %arg2[%c0_1, %c0_2] : memref<128x256xf32, #tpu.memory_space<vmem>>, vector<128x256xf32>
    %cst = arith.constant dense<0.000000e+00> : vector<8x256xf32>
    %2 = tpu.matmul %0, %1, %cst {dimension_numbers = #tpu.dot_dimension_numbers<[1], [0], [0], [1], [0, 0, 1, 1], [], []>} : vector<8x128xf32>, vector<128x256xf32>, vector<8x256xf32> -> vector<8x256xf32>
    %c0_3 = arith.constant 0 : index
    %c0_4 = arith.constant 0 : index
    %3 = vector.load %arg3[%c0_3, %c0_4] : memref<1x256xf32, #tpu.memory_space<vmem>>, vector<1x256xf32>
    %4 = vector.broadcast %3 : vector<1x256xf32> to vector<8x256xf32>
    %5 = arith.addf %2, %4 : vector<8x256xf32>
    %6 = math.tanh %5 : vector<8x256xf32>
    %c0_5 = arith.constant 0 : index
    %c0_6 = arith.constant 0 : index
    %7 = vector.load %arg4[%c0_5, %c0_6] : memref<256x256xf32, #tpu.memory_space<vmem>>, vector<256x256xf32>
    %cst_7 = arith.constant dense<0.000000e+00> : vector<8x256xf32>
    %8 = tpu.matmul %6, %7, %cst_7 {dimension_numbers = #tpu.dot_dimension_numbers<[1], [0], [0], [1], [0, 0, 1, 1], [], []>} : vector<8x256xf32>, vector<256x256xf32>, vector<8x256xf32> -> vector<8x256xf32>
    %c0_8 = arith.constant 0 : index
    %c0_9 = arith.constant 0 : index
    %9 = vector.load %arg5[%c0_8, %c0_9] : memref<1x256xf32, #tpu.memory_space<vmem>>, vector<1x256xf32>
    %10 = vector.broadcast %9 : vector<1x256xf32> to vector<8x256xf32>
    %11 = arith.addf %8, %10 : vector<8x256xf32>
    %12 = vector.extract_strided_slice %11 {offsets = [0, 0], sizes = [8, 128], strides = [1, 1]} : vector<8x256xf32> to vector<8x128xf32>
    %c0_10 = arith.constant 0 : index
    %c0_11 = arith.constant 0 : index
    %c0_12 = arith.constant 0 : index
    %13 = vector.load %arg6[%c0_10, %c0_11, %c0_12] : memref<8x2x128xf32, #tpu.memory_space<vmem>>, vector<8x1x128xf32>
    %14 = vector.shape_cast %13 : vector<8x1x128xf32> to vector<8x128xf32>
    %15 = vector.shape_cast %12 : vector<8x128xf32> to vector<8x1x128xf32>
    tpu.vector_store %arg6[%c0_10, %c0_11, %c0_12], %15 {strides = array<i32>} : memref<8x2x128xf32, #tpu.memory_space<vmem>>, vector<8x1x128xf32>,
    %16 = vector.extract_strided_slice %11 {offsets = [0, 128], sizes = [8, 128], strides = [1, 1]} : vector<8x256xf32> to vector<8x128xf32>
    %c0_13 = arith.constant 0 : index
    %c1 = arith.constant 1 : index
    %c0_14 = arith.constant 0 : index
    %17 = vector.load %arg6[%c0_13, %c1, %c0_14] : memref<8x2x128xf32, #tpu.memory_space<vmem>>, vector<8x1x128xf32>
    %18 = vector.shape_cast %17 : vector<8x1x128xf32> to vector<8x128xf32>
    %19 = vector.shape_cast %16 : vector<8x128xf32> to vector<8x1x128xf32>
    tpu.vector_store %arg6[%c0_13, %c1, %c0_14], %19 {strides = array<i32>} : memref<8x2x128xf32, #tpu.memory_space<vmem>>, vector<8x1x128xf32>,
    return
  }
  func.func @transform_0(%arg0: i32) -> (i32, i32) {
    %c0_i32 = arith.constant 0 : i32
    %c0_i32_0 = arith.constant 0 : i32
    return %arg0, %c0_i32 : i32, i32
  }
  func.func @transform_1(%arg0: i32) -> (i32, i32) {
    %c0_i32 = arith.constant 0 : i32
    %c0_i32_0 = arith.constant 0 : i32
    %c0_i32_1 = arith.constant 0 : i32
    return %c0_i32, %c0_i32_0 : i32, i32
  }
  func.func @transform_2(%arg0: i32) -> (i32, i32) {
    %c0_i32 = arith.constant 0 : i32
    %c0_i32_0 = arith.constant 0 : i32
    %c0_i32_1 = arith.constant 0 : i32
    return %c0_i32, %c0_i32_0 : i32, i32
  }
  func.func @transform_3(%arg0: i32) -> (i32, i32) {
    %c0_i32 = arith.constant 0 : i32
    %c0_i32_0 = arith.constant 0 : i32
    %c0_i32_1 = arith.constant 0 : i32
    return %c0_i32, %c0_i32_0 : i32, i32
  }
  func.func @transform_4(%arg0: i32) -> (i32, i32) {
    %c0_i32 = arith.constant 0 : i32
    %c0_i32_0 = arith.constant 0 : i32
    %c0_i32_1 = arith.constant 0 : i32
    return %c0_i32, %c0_i32_0 : i32, i32
  }
  func.func @transform_5(%arg0: i32) -> (i32, i32, i32) {
    %c0_i32 = arith.constant 0 : i32
    %c0_i32_0 = arith.constant 0 : i32
    %c0_i32_1 = arith.constant 0 : i32
    return %arg0, %c0_i32, %c0_i32_0 : i32, i32, i32
  }
}

</mosaic_0001>

<bundles_post_ra>
// kernel: tpu_custom_call.1
= control target key start
LH: loop header
LB: loop body
LE: loop exit
PB: predicated region body
PF: predicated region fallthrough
CT: control target
= control target key end

     0   :  { %10 = vsyncpa [#allocation3], 0  ;;  %s576_s0 = inlined_call_operand.hbm [shape: f32[8,128], index: 0, kind: input, shape index: {}]   ;;  %s577_s1 = inlined_call_operand.hbm [shape: f32[128,256], index: 1, kind: input, shape index: {}]   ;;  %s578_s2 = inlined_call_operand.hbm [shape: f32[1,256], index: 2, kind: input, shape index: {}]   ;;  %s579_s3 = inlined_call_operand.hbm [shape: f32[256,256], index: 3, kind: input, shape index: {}]   ;;  %s580_s4 = inlined_call_operand.vmem [shape: f32[1,256], index: 4, kind: input, shape index: {}]   ;;  %s581_s5 = inlined_call_operand.hbm [shape: f32[8,2,128], index: 5, kind: output, shape index: {}]  }
   0x1   :  { %11 = vsyncpa [#allocation6], 0 }
   0x2   :  { %12 = vsyncpa [#allocation9], 0  ;;  %s29_s20 = sshll.u32 %s577_s1, 4  ;;  %s30_s20 = int_to_ptr.hbm [resolvable:$true] %s29_s20 }
   0x3   :  { %13 = vsyncpa [#allocation4], 0  ;;  %s519_s21 = smov [#allocation5]   ;;  %s19_s25 = sshll.u32 %s576_s0, 4  ;;  %s20_s25 = int_to_ptr.hbm [resolvable:$true] %s19_s25 }
   0x4   :  { %s31_s22 = sshll.u32 %s519_s21, 4  ;;  %s520_s26 = smov 256   ;;  %s32_s22 = int_to_ptr.vmem [resolvable:$true] %s31_s22 }
   0x5   :  { %s521_s27 = smov 16   ;;  %s522_s28 = smov [#allocation2]  }
   0x6   :  { %37 = dma.hbm_to_vmem [thread:$0]  %s30_s20, 4096, %s32_s22, [#allocation6], %s520_s26, %s520_s26, %s521_s27  }
   0x7   :  { %s21_s29 = sshll.u32 %s522_s28, 4  ;;  %s43_s7 = sshll.u32 %s578_s2, 4  ;;  %s22_s29 = int_to_ptr.vmem [resolvable:$true] %s21_s29  ;;  %s44_s7 = int_to_ptr.hbm [resolvable:$true] %s43_s7 }
   0x8   :  { %24 = dma.hbm_to_vmem [thread:$0]  %s20_s25, 128, %s22_s29, [#allocation3]  }
   0x9   :  { %s53_s9 = sshll.u32 %s579_s3, 4  ;;  %s523_s10 = smov [#allocation7]   ;;  %s54_s9 = int_to_ptr.hbm [resolvable:$true] %s53_s9 }
   0xa   :  { %s45_s11 = sshll.u32 %s523_s10, 4  ;;  %s524_s0 = smov [#allocation8]   ;;  %s46_s11 = int_to_ptr.vmem [resolvable:$true] %s45_s11 }
   0xb   :  { %48 = dma.hbm_to_vmem [thread:$0]  %s44_s7, 32, %s46_s11, [#allocation6]  }
   0xc   :  { %s55_s12 = sshll.u32 %s524_s0, 4  ;;  %s56_s12 = int_to_ptr.vmem [resolvable:$true] %s55_s12 }
   0xd   :  { %61 = dma.hbm_to_vmem [thread:$0]  %s54_s9, 8192, %s56_s12, [#allocation9], %s520_s26, %s520_s26, %s521_s27  }
   0xe   :  { %511 = dma.done.wait [#allocation3], 128  }
   0xf   :  { %512 = vsyncadd [#allocation3], 4294967168 }
  0x10   :  { %513 = dma.done.wait [#allocation6], 4128  }
  0x11   :  { %514 = vsyncadd [#allocation6], 4294963168 }
  0x12   :  { %515 = dma.done.wait [#allocation9], 8192  }
  0x13   :  { %516 = vsyncadd [#allocation9], 4294959104  ;;  %v111_v0 = vld [vmem:[#allocation5 + $0xf0] sm:$0xff]  ;;  %v109_v1 = vld [vmem:[#allocation5 + $0xe0] sm:$0xff]  ;;  %s363_s16 = sshll.u32 %s581_s5, 4  ;;  %s526_s17 = smov 32   ;;  %s364_s16 = int_to_ptr.hbm [resolvable:$true] %s363_s16 }
  0x14   :  { %v112_v2 = vld [vmem:[#allocation5 + $0xf8] sm:$0xff]  ;;  %119 = vmatpush.msra.mxu0 %v111_v0  ;;  %v110_v3 = vld [vmem:[#allocation5 + $0xe8] sm:$0xff]  ;;  %v107_v4 = vld [vmem:[#allocation5 + $0xd0] sm:$0xff]  ;;  %s527_s18 = smov 2  }
  0x15   :  { %139 = vmatpush.msra.mxu1 %v112_v2  ;;  %v108_v5 = vld [vmem:[#allocation5 + $0xd8] sm:$0xff]  ;;  %v105_v6 = vld [vmem:[#allocation5 + $0xc0] sm:$0xff]  ;;  %v106_v7 = vld [vmem:[#allocation5 + $0xc8] sm:$0xff] }
  0x16   :  { %120 = vmatpush.msra.mxu0 %v109_v1  ;;  %v103_v8 = vld [vmem:[#allocation5 + $0xb0] sm:$0xff]  ;;  %v104_v9 = vld [vmem:[#allocation5 + $0xb8] sm:$0xff]  ;;  %v101_v10 = vld [vmem:[#allocation5 + $0xa0] sm:$0xff] }
  0x17   :  { %140 = vmatpush.msra.mxu1 %v110_v3  ;;  %v102_v11 = vld [vmem:[#allocation5 + $0xa8] sm:$0xff]  ;;  %v99_v12 = vld [vmem:[#allocation5 + $0x90] sm:$0xff]  ;;  %v100_v13 = vld [vmem:[#allocation5 + $0x98] sm:$0xff] }
  0x18   :  { %121 = vmatpush.msra.mxu0 %v107_v4  ;;  %v191_v14 = vld [vmem:[#allocation8 + $0xf0] sm:$0xff]  ;;  %v189_v15 = vld [vmem:[#allocation8 + $0xe0] sm:$0xff]  ;;  %v192_v52 = vld [vmem:[#allocation8 + $0xf8] sm:$0xff] }
  0x19   :  { %141 = vmatpush.msra.mxu1 %v108_v5  ;;  %v97_v16 = vld [vmem:[#allocation5 + $0x80] sm:$0xff]  ;;  %v98_v17 = vld [vmem:[#allocation5 + $0x88] sm:$0xff]  ;;  %231 = vmatpush.msra.mxu2 %v191_v14  ;;  %v223_v18 = vld [vmem:[#allocation8 + $0x1f0] sm:$0xff] }
  0x1a   :  { %122 = vmatpush.msra.mxu0 %v105_v6  ;;  %v187_v19 = vld [vmem:[#allocation8 + $0xd0] sm:$0xff]  ;;  %v221_v20 = vld [vmem:[#allocation8 + $0x1e0] sm:$0xff]  ;;  %251 = vmatpush.msra.mxu3 %v223_v18  ;;  %v224_v53 = vld [vmem:[#allocation8 + $0x1f8] sm:$0xff] }
  0x1b   :  { %142 = vmatpush.msra.mxu1 %v106_v7  ;;  %v95_v21 = vld [vmem:[#allocation5 + $0x70] sm:$0xff]  ;;  %v96_v22 = vld [vmem:[#allocation5 + $0x78] sm:$0xff]  ;;  %232 = vmatpush.msra.mxu2 %v189_v15  ;;  %v185_v23 = vld [vmem:[#allocation8 + $0xc0] sm:$0xff] }
  0x1c   :  { %123 = vmatpush.msra.mxu0 %v103_v8  ;;  %v219_v24 = vld [vmem:[#allocation8 + $0x1d0] sm:$0xff]  ;;  %v93_v25 = vld [vmem:[#allocation5 + $0x60] sm:$0xff]  ;;  %v94_v26 = vld [vmem:[#allocation5 + $0x68] sm:$0xff]  ;;  %252 = vmatpush.msra.mxu3 %v221_v20 }
  0x1d   :  { %143 = vmatpush.msra.mxu1 %v104_v9  ;;  %233 = vmatpush.msra.mxu2 %v187_v19  ;;  %v183_v27 = vld [vmem:[#allocation8 + $0xb0] sm:$0xff]  ;;  %v217_v28 = vld [vmem:[#allocation8 + $0x1c0] sm:$0xff]  ;;  %v190_v56 = vld [vmem:[#allocation8 + $0xe8] sm:$0xff] }
  0x1e   :  { %124 = vmatpush.msra.mxu0 %v101_v10  ;;  %v91_v29 = vld [vmem:[#allocation5 + $0x50] sm:$0xff]  ;;  %v92_v30 = vld [vmem:[#allocation5 + $0x58] sm:$0xff]  ;;  %253 = vmatpush.msra.mxu3 %v219_v24  ;;  %v181_v31 = vld [vmem:[#allocation8 + $0xa0] sm:$0xff] }
  0x1f   :  { %144 = vmatpush.msra.mxu1 %v102_v11  ;;  %234 = vmatpush.msra.mxu2 %v185_v23  ;;  %v215_v32 = vld [vmem:[#allocation8 + $0x1b0] sm:$0xff]  ;;  %v89_v33 = vld [vmem:[#allocation5 + $0x40] sm:$0xff]  ;;  %v90_v34 = vld [vmem:[#allocation5 + $0x48] sm:$0xff] }
  0x20   :  { %125 = vmatpush.msra.mxu0 %v99_v12  ;;  %254 = vmatpush.msra.mxu3 %v217_v28  ;;  %v179_v35 = vld [vmem:[#allocation8 + $0x90] sm:$0xff]  ;;  %v213_v36 = vld [vmem:[#allocation8 + $0x1a0] sm:$0xff]  ;;  %v222_v57 = vld [vmem:[#allocation8 + $0x1e8] sm:$0xff] }
  0x21   :  { %145 = vmatpush.msra.mxu1 %v100_v13  ;;  %235 = vmatpush.msra.mxu2 %v183_v27  ;;  %v87_v37 = vld [vmem:[#allocation5 + $0x30] sm:$0xff]  ;;  %v88_v38 = vld [vmem:[#allocation5 + $0x38] sm:$0xff]  ;;  %v177_v39 = vld [vmem:[#allocation8 + $0x80] sm:$0xff] }
  0x22   :  { %126 = vmatpush.msra.mxu0 %v97_v16  ;;  %255 = vmatpush.msra.mxu3 %v215_v32  ;;  %v211_v40 = vld [vmem:[#allocation8 + $0x190] sm:$0xff]  ;;  %v85_v41 = vld [vmem:[#allocation5 + $0x20] sm:$0xff]  ;;  %v86_v42 = vld [vmem:[#allocation5 + $0x28] sm:$0xff] }
  0x23   :  { %146 = vmatpush.msra.mxu1 %v98_v17  ;;  %236 = vmatpush.msra.mxu2 %v181_v31  ;;  %v175_v43 = vld [vmem:[#allocation8 + $0x70] sm:$0xff]  ;;  %v209_v44 = vld [vmem:[#allocation8 + $0x180] sm:$0xff]  ;;  %v188_v58 = vld [vmem:[#allocation8 + $0xd8] sm:$0xff] }
  0x24   :  { %127 = vmatpush.msra.mxu0 %v95_v21  ;;  %256 = vmatpush.msra.mxu3 %v213_v36  ;;  %v83_v45 = vld [vmem:[#allocation5 + $0x10] sm:$0xff]  ;;  %v84_v46 = vld [vmem:[#allocation5 + $0x18] sm:$0xff]  ;;  %v173_v47 = vld [vmem:[#allocation8 + $0x60] sm:$0xff] }
  0x25   :  { %147 = vmatpush.msra.mxu1 %v96_v22  ;;  %237 = vmatpush.msra.mxu2 %v179_v35  ;;  %v207_v48 = vld [vmem:[#allocation8 + $0x170] sm:$0xff]  ;;  %v81_v49 = vld [vmem:[#allocation5] sm:$0xff]  ;;  %v82_v50 = vld [vmem:[#allocation5 + $0x8] sm:$0xff] }
  0x26   :  { %128 = vmatpush.msra.mxu0 %v93_v25  ;;  %257 = vmatpush.msra.mxu3 %v211_v40  ;;  %v80_v51 = vld [vmem:[#allocation2] sm:$0xff]  ;;  %v205_v55 = vld [vmem:[#allocation8 + $0x160] sm:$0xff]  ;;  %v186_v60 = vld [vmem:[#allocation8 + $0xc8] sm:$0xff] }
  0x27   :  { %148 = vmatpush.msra.mxu1 %v94_v26  ;;  %238 = vmatpush.msra.mxu2 %v177_v39  ;;  %v171_v54 = vld [vmem:[#allocation8 + $0x50] sm:$0xff]  ;;  %v220_v59 = vld [vmem:[#allocation8 + $0x1d8] sm:$0xff]  ;;  %v218_v61 = vld [vmem:[#allocation8 + $0x1c8] sm:$0xff] }
  0x28   :  { %129 = vmatpush.msra.mxu0 %v91_v29  ;;  %258 = vmatpush.msra.mxu3 %v209_v44  ;;  %v184_v62 = vld [vmem:[#allocation8 + $0xb8] sm:$0xff]  ;;  %v182_v0 = vld [vmem:[#allocation8 + $0xa8] sm:$0xff]  ;;  %v169_v11 = vld [vmem:[#allocation8 + $0x40] sm:$0xff] }
  0x29   :  { %149 = vmatpush.msra.mxu1 %v92_v30  ;;  %239 = vmatpush.msra.mxu2 %v175_v43  ;;  %v216_v63 = vld [vmem:[#allocation8 + $0x1b8] sm:$0xff]  ;;  %v214_v1 = vld [vmem:[#allocation8 + $0x1a8] sm:$0xff]  ;;  %v203_v12 = vld [vmem:[#allocation8 + $0x150] sm:$0xff] }
  0x2a   :  { %130 = vmatpush.msra.mxu0 %v89_v33  ;;  %259 = vmatpush.msra.mxu3 %v207_v48  ;;  %v180_v2 = vld [vmem:[#allocation8 + $0x98] sm:$0xff]  ;;  %v178_v4 = vld [vmem:[#allocation8 + $0x88] sm:$0xff]  ;;  %v167_v15 = vld [vmem:[#allocation8 + $0x30] sm:$0xff] }
  0x2b   :  { %150 = vmatpush.msra.mxu1 %v90_v34  ;;  %240 = vmatpush.msra.mxu2 %v173_v47  ;;  %v212_v3 = vld [vmem:[#allocation8 + $0x198] sm:$0xff]  ;;  %v210_v5 = vld [vmem:[#allocation8 + $0x188] sm:$0xff]  ;;  %v201_v16 = vld [vmem:[#allocation8 + $0x140] sm:$0xff] }
  0x2c   :  { %131 = vmatpush.msra.mxu0 %v87_v37  ;;  %260 = vmatpush.msra.mxu3 %v205_v55  ;;  %v176_v6 = vld [vmem:[#allocation8 + $0x78] sm:$0xff]  ;;  %v174_v8 = vld [vmem:[#allocation8 + $0x68] sm:$0xff]  ;;  %v165_v19 = vld [vmem:[#allocation8 + $0x20] sm:$0xff] }
  0x2d   :  { %151 = vmatpush.msra.mxu1 %v88_v38  ;;  %241 = vmatpush.msra.mxu2 %v171_v54  ;;  %v208_v7 = vld [vmem:[#allocation8 + $0x178] sm:$0xff]  ;;  %v206_v9 = vld [vmem:[#allocation8 + $0x168] sm:$0xff]  ;;  %v199_v20 = vld [vmem:[#allocation8 + $0x130] sm:$0xff] }
  0x2e   :  { %132 = vmatpush.msra.mxu0 %v85_v41  ;;  %v172_v10 = vld [vmem:[#allocation8 + $0x58] sm:$0xff]  ;;  %v170_v13 = vld [vmem:[#allocation8 + $0x48] sm:$0xff]  ;;  %261 = vmatpush.msra.mxu3 %v203_v12  ;;  %v163_v23 = vld [vmem:[#allocation8 + $0x10] sm:$0xff] }
  0x2f   :  { %152 = vmatpush.msra.mxu1 %v86_v42  ;;  %242 = vmatpush.msra.mxu2 %v169_v11  ;;  %v204_v14 = vld [vmem:[#allocation8 + $0x158] sm:$0xff]  ;;  %v202_v18 = vld [vmem:[#allocation8 + $0x148] sm:$0xff]  ;;  %v197_v24 = vld [vmem:[#allocation8 + $0x120] sm:$0xff] }
  0x30   :  { %133 = vmatpush.msra.mxu0 %v83_v45  ;;  %v168_v17 = vld [vmem:[#allocation8 + $0x38] sm:$0xff]  ;;  %262 = vmatpush.msra.mxu3 %v201_v16  ;;  %v166_v21 = vld [vmem:[#allocation8 + $0x28] sm:$0xff]  ;;  %v161_v27 = vld [vmem:[#allocation8] sm:$0xff] }
  0x31   :  { %153 = vmatpush.msra.mxu1 %v84_v46  ;;  %243 = vmatpush.msra.mxu2 %v167_v15  ;;  %v200_v22 = vld [vmem:[#allocation8 + $0x138] sm:$0xff]  ;;  %v198_v26 = vld [vmem:[#allocation8 + $0x128] sm:$0xff]  ;;  %v195_v28 = vld [vmem:[#allocation8 + $0x110] sm:$0xff] }
  0x32   :  { %134 = vmatpush.msra.mxu0 %v81_v49  ;;  %263 = vmatpush.msra.mxu3 %v199_v20  ;;  %v164_v25 = vld [vmem:[#allocation8 + $0x18] sm:$0xff]  ;;  %v162_v29 = vld [vmem:[#allocation8 + $0x8] sm:$0xff]  ;;  %v193_v31 = vld [vmem:[#allocation8 + $0x100] sm:$0xff] }
  0x33   :  { %154 = vmatpush.msra.mxu1 %v82_v50  ;;  %135 = vmatmul.f32.vlgmr.msra.gmra.mxu0 %v80_v51  ;;  %v196_v30 = vld [vmem:[#allocation8 + $0x118] sm:$0xff]  ;;  %v194_v32 = vld [vmem:[#allocation8 + $0x108] sm:$0xff]  ;;  %v225_v42 = vld [vmem:[%s580_s4] sm:$0x3]  ;;  %s525_s4 = smov [#allocation10]  }
  0x34   :  { %155 = vmatmul.f32.vlgmr.msra.gmra.mxu1 %v80_v51  ;;  %271 = vmatpush.msrb.mxu0 %v192_v52  ;;  %v113_v33 = vld [vmem:[#allocation7] sm:$0x3]  ;;  %v228_v43 = vperm.slane %v225_v42, 1  ;;  %v227_v48 = vperm.slane %v225_v42, 0  ;;  %s361_s13 = sshll.u32 %s525_s4, 4  ;;  %s362_s13 = int_to_ptr.vmem [resolvable:$true] %s361_s13 }
  0x35   :  { %291 = vmatpush.msrb.mxu1 %v224_v53  ;;  %244 = vmatpush.msra.mxu2 %v165_v19  ;;  %v115_v34 = vperm.slane %v113_v33, 0  ;;  %v116_v35 = vperm.slane %v113_v33, 1 }
  0x36   :  { %272 = vmatpush.msrb.mxu0 %v190_v56  ;;  %264 = vmatpush.msra.mxu3 %v197_v24 }
  0x37   :  { %292 = vmatpush.msrb.mxu1 %v222_v57  ;;  %245 = vmatpush.msra.mxu2 %v163_v23 }
  0x38   :  { %273 = vmatpush.msrb.mxu0 %v188_v58  ;;  %265 = vmatpush.msra.mxu3 %v195_v28 }
  0x39   :  { %293 = vmatpush.msrb.mxu1 %v220_v59  ;;  %246 = vmatpush.msra.mxu2 %v161_v27 }
  0x3a   :  { %274 = vmatpush.msrb.mxu0 %v186_v60  ;;  %266 = vmatpush.msra.mxu3 %v193_v31 }
  0x3b   :  { %294 = vmatpush.msrb.mxu1 %v218_v61 }
  0x3c   :  { %275 = vmatpush.msrb.mxu0 %v184_v62 }
  0x3d   :  { %295 = vmatpush.msrb.mxu1 %v216_v63 }
  0x3e   :  { %276 = vmatpush.msrb.mxu0 %v182_v0 }
  0x3f   :  { %296 = vmatpush.msrb.mxu1 %v214_v1 }
  0x40   :  { %277 = vmatpush.msrb.mxu0 %v180_v2 }
  0x41   :  { %297 = vmatpush.msrb.mxu1 %v212_v3 }
  0x42   :  { %278 = vmatpush.msrb.mxu0 %v178_v4 }
  0x43   :  { %298 = vmatpush.msrb.mxu1 %v210_v5 }
  0x44   :  { %279 = vmatpush.msrb.mxu0 %v176_v6 }
  0x45   :  { %299 = vmatpush.msrb.mxu1 %v208_v7 }
  0x46   :  { %280 = vmatpush.msrb.mxu0 %v174_v8 }
  0x47   :  { %300 = vmatpush.msrb.mxu1 %v206_v9 }
  0x48   :  { %281 = vmatpush.msrb.mxu0 %v172_v10 }
  0x49   :  { %301 = vmatpush.msrb.mxu1 %v204_v14 }
  0x4a   :  { %282 = vmatpush.msrb.mxu0 %v170_v13 }
  0x4b   :  { %302 = vmatpush.msrb.mxu1 %v202_v18 }
  0x4c   :  { %283 = vmatpush.msrb.mxu0 %v168_v17 }
  0x4d   :  { %303 = vmatpush.msrb.mxu1 %v200_v22 }
  0x4e   :  { %284 = vmatpush.msrb.mxu0 %v166_v21 }
  0x4f   :  { %304 = vmatpush.msrb.mxu1 %v198_v26 }
  0x50   :  { %285 = vmatpush.msrb.mxu0 %v164_v25 }
  0x51   :  { %305 = vmatpush.msrb.mxu1 %v196_v30 }
  0x52   :  { %286 = vmatpush.msrb.mxu0 %v162_v29 }
  0x53   :  { %306 = vmatpush.msrb.mxu1 %v194_v32 }
  0xb0   :  { %v136_v36 = vpop.f32.mrf.mxu0 }
  0xb1   :  { %v156_v37 = vpop.f32.mrf.mxu1  ;;  %v137_v38 = vadd.f32 %v136_v36, %v115_v34 }
  0xb2   :  { %v157_v39 = vadd.f32 %v156_v37, %v116_v35 }
  0xb3   :  { %387 = vtanh.f32 %v137_v38 }
  0xb4   :  { %389 = vtanh.f32 %v157_v39 }
  0xb9   :  { %v388_v40 = vpop.eup %387 }
  0xba   :  { %v390_v41 = vpop.eup %389  ;;  %247 = vmatmul.f32.vlgmr.msra.gmra.mxu2 %v388_v40  ;;  %287 = vmatmul.f32.vlgmr.msrb.gmra.mxu0 %v388_v40 }
  0xbb   :  { %267 = vmatmul.f32.vlgmr.msra.gmra.mxu3 %v390_v41  ;;  %307 = vmatmul.f32.vlgmr.msrb.gmra.mxu1 %v390_v41 }
 0x137   :  { %v288_v44 = vpop.f32.mrf.mxu0 }
 0x138   :  { %v289_v45 = vadd.f32 %v288_v44, %v228_v43  ;;  %v308_v46 = vpop.f32.mrf.mxu1 }
 0x13a   :  { %v309_v47 = vadd.f32 %v308_v46, %v289_v45 }
 0x13c   :  { %v335_v49 = vrot.slane %v309_v47, 1  ;;  %v336_v50 = vrot.slane %v309_v47, 2  ;;  %v337_v51 = vrot.slane %v309_v47, 3  ;;  %349 = vst [vmem:[#allocation10 + $0x1] sm:$0x1] %v309_v47  ;;  %v338_v52 = vrot.slane %v309_v47, 4 }
 0x13d   :  { %v248_v53 = vpop.f32.mrf.mxu2  ;;  %v339_v54 = vrot.slane %v309_v47, 5  ;;  %v340_v57 = vrot.slane %v309_v47, 6  ;;  %v341_v58 = vrot.slane %v309_v47, 7 }
 0x13e   :  { %350 = vst [vmem:[#allocation10 + $0x3] sm:$0x1] %v335_v49  ;;  %v249_v55 = vadd.f32 %v248_v53, %v227_v48  ;;  %v268_v56 = vpop.f32.mrf.mxu3 }
 0x13f   :  { %351 = vst [vmem:[#allocation10 + $0x5] sm:$0x1] %v336_v50 }
 0x140   :  { %352 = vst [vmem:[#allocation10 + $0x7] sm:$0x1] %v337_v51  ;;  %v269_v59 = vadd.f32 %v268_v56, %v249_v55 }
 0x141   :  { %353 = vst [vmem:[#allocation10 + $0x9] sm:$0x1] %v338_v52 }
 0x142   :  { %354 = vst [vmem:[#allocation10 + $0xb] sm:$0x1] %v339_v54  ;;  %v312_v60 = vrot.slane %v269_v59, 1  ;;  %v313_v61 = vrot.slane %v269_v59, 2  ;;  %v314_v62 = vrot.slane %v269_v59, 3  ;;  %v315_v63 = vrot.slane %v269_v59, 4 }
 0x143   :  { %355 = vst [vmem:[#allocation10 + $0xd] sm:$0x1] %v340_v57  ;;  %v316_v0 = vrot.slane %v269_v59, 5  ;;  %v317_v1 = vrot.slane %v269_v59, 6  ;;  %v318_v2 = vrot.slane %v269_v59, 7 }
 0x144   :  { %356 = vst [vmem:[#allocation10 + $0xf] sm:$0x1] %v341_v58 }
 0x145   :  { %326 = vst [vmem:[#allocation10] sm:$0x1] %v269_v59 }
 0x146   :  { %327 = vst [vmem:[#allocation10 + $0x2] sm:$0x1] %v312_v60 }
 0x147   :  { %328 = vst [vmem:[#allocation10 + $0x4] sm:$0x1] %v313_v61 }
 0x148   :  { %329 = vst [vmem:[#allocation10 + $0x6] sm:$0x1] %v314_v62 }
 0x149   :  { %330 = vst [vmem:[#allocation10 + $0x8] sm:$0x1] %v315_v63 }
 0x14a   :  { %331 = vst [vmem:[#allocation10 + $0xa] sm:$0x1] %v316_v0 }
 0x14b   :  { %332 = vst [vmem:[#allocation10 + $0xc] sm:$0x1] %v317_v1 }
 0x14c   :  { %333 = vst [vmem:[#allocation10 + $0xe] sm:$0x1] %v318_v2 }
 0x14d   :  { %369 = dma.vmem_to_hbm [thread:$0]  %s362_s13, 256, %s364_s16, [#allocation4], %s526_s17, %s526_s17, %s527_s18  }
 0x14e   :  { %517 = dma.done.wait [#allocation4], 256  }
 0x14f   :  { %518 = vsyncadd [#allocation4], 4294967040 }
 0x150   :  { %374 = vsyncpa [#allocation3], 1 }
 0x151   :  { %375 = vsyncpa [#allocation6], 1 }
 0x152   :  { %376 = vsyncpa [#allocation9], 1 }
 0x153   :  { %377 = vsyncpa [#allocation4], 1 }

// kernel: tpu_custom_call.1
= control target key start
LH: loop header
LB: loop body
LE: loop exit
PB: predicated region body
PF: predicated region fallthrough
CT: control target
= control target key end

     0   :  { %10 = vsyncpa [#allocation3], 0  ;;  %s576_s0 = inlined_call_operand.hbm [shape: f32[8,128], index: 0, kind: input, shape index: {}]   ;;  %s577_s1 = inlined_call_operand.hbm [shape: f32[128,256], index: 1, kind: input, shape index: {}]   ;;  %s578_s2 = inlined_call_operand.hbm [shape: f32[1,256], index: 2, kind: input, shape index: {}]   ;;  %s579_s3 = inlined_call_operand.hbm [shape: f32[256,256], index: 3, kind: input, shape index: {}]   ;;  %s580_s4 = inlined_call_operand.vmem [shape: f32[1,256], index: 4, kind: input, shape index: {}]   ;;  %s581_s5 = inlined_call_operand.hbm [shape: f32[8,2,128], index: 5, kind: output, shape index: {}]  }
   0x1   :  { %11 = vsyncpa [#allocation6], 0 }
   0x2   :  { %12 = vsyncpa [#allocation9], 0  ;;  %s29_s20 = sshll.u32 %s577_s1, 4  ;;  %s30_s20 = int_to_ptr.hbm [resolvable:$true] %s29_s20 }
   0x3   :  { %13 = vsyncpa [#allocation4], 0  ;;  %s519_s21 = smov [#allocation5]   ;;  %s19_s25 = sshll.u32 %s576_s0, 4  ;;  %s20_s25 = int_to_ptr.hbm [resolvable:$true] %s19_s25 }
   0x4   :  { %s31_s22 = sshll.u32 %s519_s21, 4  ;;  %s520_s26 = smov 256   ;;  %s32_s22 = int_to_ptr.vmem [resolvable:$true] %s31_s22 }
   0x5   :  { %s521_s27 = smov 16   ;;  %s522_s28 = smov [#allocation2]  }
   0x6   :  { %37 = dma.hbm_to_vmem [thread:$0]  %s30_s20, 4096, %s32_s22, [#allocation6], %s520_s26, %s520_s26, %s521_s27  }
   0x7   :  { %s21_s29 = sshll.u32 %s522_s28, 4  ;;  %s43_s7 = sshll.u32 %s578_s2, 4  ;;  %s22_s29 = int_to_ptr.vmem [resolvable:$true] %s21_s29  ;;  %s44_s7 = int_to_ptr.hbm [resolvable:$true] %s43_s7 }
   0x8   :  { %24 = dma.hbm_to_vmem [thread:$0]  %s20_s25, 128, %s22_s29, [#allocation3]  }
   0x9   :  { %s53_s9 = sshll.u32 %s579_s3, 4  ;;  %s523_s10 = smov [#allocation7]   ;;  %s54_s9 = int_to_ptr.hbm [resolvable:$true] %s53_s9 }
   0xa   :  { %s45_s11 = sshll.u32 %s523_s10, 4  ;;  %s524_s0 = smov [#allocation8]   ;;  %s46_s11 = int_to_ptr.vmem [resolvable:$true] %s45_s11 }
   0xb   :  { %48 = dma.hbm_to_vmem [thread:$0]  %s44_s7, 32, %s46_s11, [#allocation6]  }
   0xc   :  { %s55_s12 = sshll.u32 %s524_s0, 4  ;;  %s56_s12 = int_to_ptr.vmem [resolvable:$true] %s55_s12 }
   0xd   :  { %61 = dma.hbm_to_vmem [thread:$0]  %s54_s9, 8192, %s56_s12, [#allocation9], %s520_s26, %s520_s26, %s521_s27  }
   0xe   :  { %511 = dma.done.wait [#allocation3], 128  }
   0xf   :  { %512 = vsyncadd [#allocation3], 4294967168 }
  0x10   :  { %513 = dma.done.wait [#allocation6], 4128  }
  0x11   :  { %514 = vsyncadd [#allocation6], 4294963168 }
  0x12   :  { %515 = dma.done.wait [#allocation9], 8192  }
  0x13   :  { %516 = vsyncadd [#allocation9], 4294959104  ;;  %v111_v0 = vld [vmem:[#allocation5 + $0xf0] sm:$0xff]  ;;  %v109_v1 = vld [vmem:[#allocation5 + $0xe0] sm:$0xff]  ;;  %s363_s16 = sshll.u32 %s581_s5, 4  ;;  %s526_s17 = smov 32   ;;  %s364_s16 = int_to_ptr.hbm [resolvable:$true] %s363_s16 }
  0x14   :  { %v112_v2 = vld [vmem:[#allocation5 + $0xf8] sm:$0xff]  ;;  %119 = vmatpush.msra.mxu0 %v111_v0  ;;  %v110_v3 = vld [vmem:[#allocation5 + $0xe8] sm:$0xff]  ;;  %v107_v4 = vld [vmem:[#allocation5 + $0xd0] sm:$0xff]  ;;  %s527_s18 = smov 2  }
  0x15   :  { %139 = vmatpush.msra.mxu1 %v112_v2  ;;  %v108_v5 = vld [vmem:[#allocation5 + $0xd8] sm:$0xff]  ;;  %v105_v6 = vld [vmem:[#allocation5 + $0xc0] sm:$0xff]  ;;  %v106_v7 = vld [vmem:[#allocation5 + $0xc8] sm:$0xff] }
  0x16   :  { %120 = vmatpush.msra.mxu0 %v109_v1  ;;  %v103_v8 = vld [vmem:[#allocation5 + $0xb0] sm:$0xff]  ;;  %v104_v9 = vld [vmem:[#allocation5 + $0xb8] sm:$0xff]  ;;  %v101_v10 = vld [vmem:[#allocation5 + $0xa0] sm:$0xff] }
  0x17   :  { %140 = vmatpush.msra.mxu1 %v110_v3  ;;  %v102_v11 = vld [vmem:[#allocation5 + $0xa8] sm:$0xff]  ;;  %v99_v12 = vld [vmem:[#allocation5 + $0x90] sm:$0xff]  ;;  %v100_v13 = vld [vmem:[#allocation5 + $0x98] sm:$0xff] }
  0x18   :  { %121 = vmatpush.msra.mxu0 %v107_v4  ;;  %v191_v14 = vld [vmem:[#allocation8 + $0xf0] sm:$0xff]  ;;  %v189_v15 = vld [vmem:[#allocation8 + $0xe0] sm:$0xff]  ;;  %v192_v52 = vld [vmem:[#allocation8 + $0xf8] sm:$0xff] }
  0x19   :  { %141 = vmatpush.msra.mxu1 %v108_v5  ;;  %v97_v16 = vld [vmem:[#allocation5 + $0x80] sm:$0xff]  ;;  %v98_v17 = vld [vmem:[#allocation5 + $0x88] sm:$0xff]  ;;  %231 = vmatpush.msra.mxu2 %v191_v14  ;;  %v223_v18 = vld [vmem:[#allocation8 + $0x1f0] sm:$0xff] }
  0x1a   :  { %122 = vmatpush.msra.mxu0 %v105_v6  ;;  %v187_v19 = vld [vmem:[#allocation8 + $0xd0] sm:$0xff]  ;;  %v221_v20 = vld [vmem:[#allocation8 + $0x1e0] sm:$0xff]  ;;  %251 = vmatpush.msra.mxu3 %v223_v18  ;;  %v224_v53 = vld [vmem:[#allocation8 + $0x1f8] sm:$0xff] }
  0x1b   :  { %142 = vmatpush.msra.mxu1 %v106_v7  ;;  %v95_v21 = vld [vmem:[#allocation5 + $0x70] sm:$0xff]  ;;  %v96_v22 = vld [vmem:[#allocation5 + $0x78] sm:$0xff]  ;;  %232 = vmatpush.msra.mxu2 %v189_v15  ;;  %v185_v23 = vld [vmem:[#allocation8 + $0xc0] sm:$0xff] }
  0x1c   :  { %123 = vmatpush.msra.mxu0 %v103_v8  ;;  %v219_v24 = vld [vmem:[#allocation8 + $0x1d0] sm:$0xff]  ;;  %v93_v25 = vld [vmem:[#allocation5 + $0x60] sm:$0xff]  ;;  %v94_v26 = vld [vmem:[#allocation5 + $0x68] sm:$0xff]  ;;  %252 = vmatpush.msra.mxu3 %v221_v20 }
  0x1d   :  { %143 = vmatpush.msra.mxu1 %v104_v9  ;;  %233 = vmatpush.msra.mxu2 %v187_v19  ;;  %v183_v27 = vld [vmem:[#allocation8 + $0xb0] sm:$0xff]  ;;  %v217_v28 = vld [vmem:[#allocation8 + $0x1c0] sm:$0xff]  ;;  %v190_v56 = vld [vmem:[#allocation8 + $0xe8] sm:$0xff] }
  0x1e   :  { %124 = vmatpush.msra.mxu0 %v101_v10  ;;  %v91_v29 = vld [vmem:[#allocation5 + $0x50] sm:$0xff]  ;;  %v92_v30 = vld [vmem:[#allocation5 + $0x58] sm:$0xff]  ;;  %253 = vmatpush.msra.mxu3 %v219_v24  ;;  %v181_v31 = vld [vmem:[#allocation8 + $0xa0] sm:$0xff] }
  0x1f   :  { %144 = vmatpush.msra.mxu1 %v102_v11  ;;  %234 = vmatpush.msra.mxu2 %v185_v23  ;;  %v215_v32 = vld [vmem:[#allocation8 + $0x1b0] sm:$0xff]  ;;  %v89_v33 = vld [vmem:[#allocation5 + $0x40] sm:$0xff]  ;;  %v90_v34 = vld [vmem:[#allocation5 + $0x48] sm:$0xff] }
  0x20   :  { %125 = vmatpush.msra.mxu0 %v99_v12  ;;  %254 = vmatpush.msra.mxu3 %v217_v28  ;;  %v179_v35 = vld [vmem:[#allocation8 + $0x90] sm:$0xff]  ;;  %v213_v36 = vld [vmem:[#allocation8 + $0x1a0] sm:$0xff]  ;;  %v222_v57 = vld [vmem:[#allocation8 + $0x1e8] sm:$0xff] }
  0x21   :  { %145 = vmatpush.msra.mxu1 %v100_v13  ;;  %235 = vmatpush.msra.mxu2 %v183_v27  ;;  %v87_v37 = vld [vmem:[#allocation5 + $0x30] sm:$0xff]  ;;  %v88_v38 = vld [vmem:[#allocation5 + $0x38] sm:$0xff]  ;;  %v177_v39 = vld [vmem:[#allocation8 + $0x80] sm:$0xff] }
  0x22   :  { %126 = vmatpush.msra.mxu0 %v97_v16  ;;  %255 = vmatpush.msra.mxu3 %v215_v32  ;;  %v211_v40 = vld [vmem:[#allocation8 + $0x190] sm:$0xff]  ;;  %v85_v41 = vld [vmem:[#allocation5 + $0x20] sm:$0xff]  ;;  %v86_v42 = vld [vmem:[#allocation5 + $0x28] sm:$0xff] }
  0x23   :  { %146 = vmatpush.msra.mxu1 %v98_v17  ;;  %236 = vmatpush.msra.mxu2 %v181_v31  ;;  %v175_v43 = vld [vmem:[#allocation8 + $0x70] sm:$0xff]  ;;  %v209_v44 = vld [vmem:[#allocation8 + $0x180] sm:$0xff]  ;;  %v188_v58 = vld [vmem:[#allocation8 + $0xd8] sm:$0xff] }
  0x24   :  { %127 = vmatpush.msra.mxu0 %v95_v21  ;;  %256 = vmatpush.msra.mxu3 %v213_v36  ;;  %v83_v45 = vld [vmem:[#allocation5 + $0x10] sm:$0xff]  ;;  %v84_v46 = vld [vmem:[#allocation5 + $0x18] sm:$0xff]  ;;  %v173_v47 = vld [vmem:[#allocation8 + $0x60] sm:$0xff] }
  0x25   :  { %147 = vmatpush.msra.mxu1 %v96_v22  ;;  %237 = vmatpush.msra.mxu2 %v179_v35  ;;  %v207_v48 = vld [vmem:[#allocation8 + $0x170] sm:$0xff]  ;;  %v81_v49 = vld [vmem:[#allocation5] sm:$0xff]  ;;  %v82_v50 = vld [vmem:[#allocation5 + $0x8] sm:$0xff] }
  0x26   :  { %128 = vmatpush.msra.mxu0 %v93_v25  ;;  %257 = vmatpush.msra.mxu3 %v211_v40  ;;  %v80_v51 = vld [vmem:[#allocation2] sm:$0xff]  ;;  %v205_v55 = vld [vmem:[#allocation8 + $0x160] sm:$0xff]  ;;  %v186_v60 = vld [vmem:[#allocation8 + $0xc8] sm:$0xff] }
  0x27   :  { %148 = vmatpush.msra.mxu1 %v94_v26  ;;  %238 = vmatpush.msra.mxu2 %v177_v39  ;;  %v171_v54 = vld [vmem:[#allocation8 + $0x50] sm:$0xff]  ;;  %v220_v59 = vld [vmem:[#allocation8 + $0x1d8] sm:$0xff]  ;;  %v218_v61 = vld [vmem:[#allocation8 + $0x1c8] sm:$0xff] }
  0x28   :  { %129 = vmatpush.msra.mxu0 %v91_v29  ;;  %258 = vmatpush.msra.mxu3 %v209_v44  ;;  %v184_v62 = vld [vmem:[#allocation8 + $0xb8] sm:$0xff]  ;;  %v182_v0 = vld [vmem:[#allocation8 + $0xa8] sm:$0xff]  ;;  %v169_v11 = vld [vmem:[#allocation8 + $0x40] sm:$0xff] }
  0x29   :  { %149 = vmatpush.msra.mxu1 %v92_v30  ;;  %239 = vmatpush.msra.mxu2 %v175_v43  ;;  %v216_v63 = vld [vmem:[#allocation8 + $0x1b8] sm:$0xff]  ;;  %v214_v1 = vld [vmem:[#allocation8 + $0x1a8] sm:$0xff]  ;;  %v203_v12 = vld [vmem:[#allocation8 + $0x150] sm:$0xff] }
  0x2a   :  { %130 = vmatpush.msra.mxu0 %v89_v33  ;;  %259 = vmatpush.msra.mxu3 %v207_v48  ;;  %v180_v2 = vld [vmem:[#allocation8 + $0x98] sm:$0xff]  ;;  %v178_v4 = vld [vmem:[#allocation8 + $0x88] sm:$0xff]  ;;  %v167_v15 = vld [vmem:[#allocation8 + $0x30] sm:$0xff] }
  0x2b   :  { %150 = vmatpush.msra.mxu1 %v90_v34  ;;  %240 = vmatpush.msra.mxu2 %v173_v47  ;;  %v212_v3 = vld [vmem:[#allocation8 + $0x198] sm:$0xff]  ;;  %v210_v5 = vld [vmem:[#allocation8 + $0x188] sm:$0xff]  ;;  %v201_v16 = vld [vmem:[#allocation8 + $0x140] sm:$0xff] }
  0x2c   :  { %131 = vmatpush.msra.mxu0 %v87_v37  ;;  %260 = vmatpush.msra.mxu3 %v205_v55  ;;  %v176_v6 = vld [vmem:[#allocation8 + $0x78] sm:$0xff]  ;;  %v174_v8 = vld [vmem:[#allocation8 + $0x68] sm:$0xff]  ;;  %v165_v19 = vld [vmem:[#allocation8 + $0x20] sm:$0xff] }
  0x2d   :  { %151 = vmatpush.msra.mxu1 %v88_v38  ;;  %241 = vmatpush.msra.mxu2 %v171_v54  ;;  %v208_v7 = vld [vmem:[#allocation8 + $0x178] sm:$0xff]  ;;  %v206_v9 = vld [vmem:[#allocation8 + $0x168] sm:$0xff]  ;;  %v199_v20 = vld [vmem:[#allocation8 + $0x130] sm:$0xff] }
  0x2e   :  { %132 = vmatpush.msra.mxu0 %v85_v41  ;;  %v172_v10 = vld [vmem:[#allocation8 + $0x58] sm:$0xff]  ;;  %v170_v13 = vld [vmem:[#allocation8 + $0x48] sm:$0xff]  ;;  %261 = vmatpush.msra.mxu3 %v203_v12  ;;  %v163_v23 = vld [vmem:[#allocation8 + $0x10] sm:$0xff] }
  0x2f   :  { %152 = vmatpush.msra.mxu1 %v86_v42  ;;  %242 = vmatpush.msra.mxu2 %v169_v11  ;;  %v204_v14 = vld [vmem:[#allocation8 + $0x158] sm:$0xff]  ;;  %v202_v18 = vld [vmem:[#allocation8 + $0x148] sm:$0xff]  ;;  %v197_v24 = vld [vmem:[#allocation8 + $0x120] sm:$0xff] }
  0x30   :  { %133 = vmatpush.msra.mxu0 %v83_v45  ;;  %v168_v17 = vld [vmem:[#allocation8 + $0x38] sm:$0xff]  ;;  %262 = vmatpush.msra.mxu3 %v201_v16  ;;  %v166_v21 = vld [vmem:[#allocation8 + $0x28] sm:$0xff]  ;;  %v161_v27 = vld [vmem:[#allocation8] sm:$0xff] }
  0x31   :  { %153 = vmatpush.msra.mxu1 %v84_v46  ;;  %243 = vmatpush.msra.mxu2 %v167_v15  ;;  %v200_v22 = vld [vmem:[#allocation8 + $0x138] sm:$0xff]  ;;  %v198_v26 = vld [vmem:[#allocation8 + $0x128] sm:$0xff]  ;;  %v195_v28 = vld [vmem:[#allocation8 + $0x110] sm:$0xff] }
  0x32   :  { %134 = vmatpush.msra.mxu0 %v81_v49  ;;  %263 = vmatpush.msra.mxu3 %v199_v20  ;;  %v164_v25 = vld [vmem:[#allocation8 + $0x18] sm:$0xff]  ;;  %v162_v29 = vld [vmem:[#allocation8 + $0x8] sm:$0xff]  ;;  %v193_v31 = vld [vmem:[#allocation8 + $0x100] sm:$0xff] }
  0x33   :  { %154 = vmatpush.msra.mxu1 %v82_v50  ;;  %135 = vmatmul.f32.vlgmr.msra.gmra.mxu0 %v80_v51  ;;  %v196_v30 = vld [vmem:[#allocation8 + $0x118] sm:$0xff]  ;;  %v194_v32 = vld [vmem:[#allocation8 + $0x108] sm:$0xff]  ;;  %v225_v42 = vld [vmem:[%s580_s4] sm:$0x3]  ;;  %s525_s4 = smov [#allocation10]  }
  0x34   :  { %155 = vmatmul.f32.vlgmr.msra.gmra.mxu1 %v80_v51  ;;  %271 = vmatpush.msrb.mxu0 %v192_v52  ;;  %v113_v33 = vld [vmem:[#allocation7] sm:$0x3]  ;;  %v228_v43 = vperm.slane %v225_v42, 1  ;;  %v227_v48 = vperm.slane %v225_v42, 0  ;;  %s361_s13 = sshll.u32 %s525_s4, 4  ;;  %s362_s13 = int_to_ptr.vmem [resolvable:$true] %s361_s13 }
  0x35   :  { %291 = vmatpush.msrb.mxu1 %v224_v53  ;;  %244 = vmatpush.msra.mxu2 %v165_v19  ;;  %v115_v34 = vperm.slane %v113_v33, 0  ;;  %v116_v35 = vperm.slane %v113_v33, 1 }
  0x36   :  { %272 = vmatpush.msrb.mxu0 %v190_v56  ;;  %264 = vmatpush.msra.mxu3 %v197_v24 }
  0x37   :  { %292 = vmatpush.msrb.mxu1 %v222_v57  ;;  %245 = vmatpush.msra.mxu2 %v163_v23 }
  0x38   :  { %273 = vmatpush.msrb.mxu0 %v188_v58  ;;  %265 = vmatpush.msra.mxu3 %v195_v28 }
  0x39   :  { %293 = vmatpush.msrb.mxu1 %v220_v59  ;;  %246 = vmatpush.msra.mxu2 %v161_v27 }
  0x3a   :  { %274 = vmatpush.msrb.mxu0 %v186_v60  ;;  %266 = vmatpush.msra.mxu3 %v193_v31 }
  0x3b   :  { %294 = vmatpush.msrb.mxu1 %v218_v61 }
  0x3c   :  { %275 = vmatpush.msrb.mxu0 %v184_v62 }
  0x3d   :  { %295 = vmatpush.msrb.mxu1 %v216_v63 }
  0x3e   :  { %276 = vmatpush.msrb.mxu0 %v182_v0 }
  0x3f   :  { %296 = vmatpush.msrb.mxu1 %v214_v1 }
  0x40   :  { %277 = vmatpush.msrb.mxu0 %v180_v2 }
  0x41   :  { %297 = vmatpush.msrb.mxu1 %v212_v3 }
  0x42   :  { %278 = vmatpush.msrb.mxu0 %v178_v4 }
  0x43   :  { %298 = vmatpush.msrb.mxu1 %v210_v5 }
  0x44   :  { %279 = vmatpush.msrb.mxu0 %v176_v6 }
  0x45   :  { %299 = vmatpush.msrb.mxu1 %v208_v7 }
  0x46   :  { %280 = vmatpush.msrb.mxu0 %v174_v8 }
  0x47   :  { %300 = vmatpush.msrb.mxu1 %v206_v9 }
  0x48   :  { %281 = vmatpush.msrb.mxu0 %v172_v10 }
  0x49   :  { %301 = vmatpush.msrb.mxu1 %v204_v14 }
  0x4a   :  { %282 = vmatpush.msrb.mxu0 %v170_v13 }
  0x4b   :  { %302 = vmatpush.msrb.mxu1 %v202_v18 }
  0x4c   :  { %283 = vmatpush.msrb.mxu0 %v168_v17 }
  0x4d   :  { %303 = vmatpush.msrb.mxu1 %v200_v22 }
  0x4e   :  { %284 = vmatpush.msrb.mxu0 %v166_v21 }
  0x4f   :  { %304 = vmatpush.msrb.mxu1 %v198_v26 }
  0x50   :  { %285 = vmatpush.msrb.mxu0 %v164_v25 }
  0x51   :  { %305 = vmatpush.msrb.mxu1 %v196_v30 }
  0x52   :  { %286 = vmatpush.msrb.mxu0 %v162_v29 }
  0x53   :  { %306 = vmatpush.msrb.mxu1 %v194_v32 }
  0xb0   :  { %v136_v36 = vpop.f32.mrf.mxu0 }
  0xb1   :  { %v156_v37 = vpop.f32.mrf.mxu1  ;;  %v137_v38 = vadd.f32 %v136_v36, %v115_v34 }
  0xb2   :  { %v157_v39 = vadd.f32 %v156_v37, %v116_v35 }
  0xb3   :  { %387 = vtanh.f32 %v137_v38 }
  0xb4   :  { %389 = vtanh.f32 %v157_v39 }
  0xb9   :  { %v388_v40 = vpop.eup %387 }
  0xba   :  { %v390_v41 = vpop.eup %389  ;;  %247 = vmatmul.f32.vlgmr.msra.gmra.mxu2 %v388_v40  ;;  %287 = vmatmul.f32.vlgmr.msrb.gmra.mxu0 %v388_v40 }
  0xbb   :  { %267 = vmatmul.f32.vlgmr.msra.gmra.mxu3 %v390_v41  ;;  %307 = vmatmul.f32.vlgmr.msrb.gmra.mxu1 %v390_v41 }
 0x137   :  { %v288_v44 = vpop.f32.mrf.mxu0 }
 0x138   :  { %v289_v45 = vadd.f32 %v288_v44, %v228_v43  ;;  %v308_v46 = vpop.f32.mrf.mxu1 }
 0x13a   :  { %v309_v47 = vadd.f32 %v308_v46, %v289_v45 }
 0x13c   :  { %v335_v49 = vrot.slane %v309_v47, 1  ;;  %v336_v50 = vrot.slane %v309_v47, 2  ;;  %v337_v51 = vrot.slane %v309_v47, 3  ;;  %349 = vst [vmem:[#allocation10 + $0x1] sm:$0x1] %v309_v47  ;;  %v338_v52 = vrot.slane %v309_v47, 4 }
 0x13d   :  { %v248_v53 = vpop.f32.mrf.mxu2  ;;  %v339_v54 = vrot.slane %v309_v47, 5  ;;  %v340_v57 = vrot.slane %v309_v47, 6  ;;  %v341_v58 = vrot.slane %v309_v47, 7 }
 0x13e   :  { %350 = vst [vmem:[#allocation10 + $0x3] sm:$0x1] %v335_v49  ;;  %v249_v55 = vadd.f32 %v248_v53, %v227_v48  ;;  %v268_v56 = vpop.f32.mrf.mxu3 }
 0x13f   :  { %351 = vst [vmem:[#allocation10 + $0x5] sm:$0x1] %v336_v50 }
 0x140   :  { %352 = vst [vmem:[#allocation10 + $0x7] sm:$0x1] %v337_v51  ;;  %v269_v59 = vadd.f32 %v268_v56, %v249_v55 }
 0x141   :  { %353 = vst [vmem:[#allocation10 + $0x9] sm:$0x1] %v338_v52 }
 0x142   :  { %354 = vst [vmem:[#allocation10 + $0xb] sm:$0x1] %v339_v54  ;;  %v312_v60 = vrot.slane %v269_v59, 1  ;;  %v313_v61 = vrot.slane %v269_v59, 2  ;;  %v314_v62 = vrot.slane %v269_v59, 3  ;;  %v315_v63 = vrot.slane %v269_v59, 4 }
 0x143   :  { %355 = vst [vmem:[#allocation10 + $0xd] sm:$0x1] %v340_v57  ;;  %v316_v0 = vrot.slane %v269_v59, 5  ;;  %v317_v1 = vrot.slane %v269_v59, 6  ;;  %v318_v2 = vrot.slane %v269_v59, 7 }
 0x144   :  { %356 = vst [vmem:[#allocation10 + $0xf] sm:$0x1] %v341_v58 }
 0x145   :  { %326 = vst [vmem:[#allocation10] sm:$0x1] %v269_v59 }
 0x146   :  { %327 = vst [vmem:[#allocation10 + $0x2] sm:$0x1] %v312_v60 }
 0x147   :  { %328 = vst [vmem:[#allocation10 + $0x4] sm:$0x1] %v313_v61 }
 0x148   :  { %329 = vst [vmem:[#allocation10 + $0x6] sm:$0x1] %v314_v62 }
 0x149   :  { %330 = vst [vmem:[#allocation10 + $0x8] sm:$0x1] %v315_v63 }
 0x14a   :  { %331 = vst [vmem:[#allocation10 + $0xa] sm:$0x1] %v316_v0 }
 0x14b   :  { %332 = vst [vmem:[#allocation10 + $0xc] sm:$0x1] %v317_v1 }
 0x14c   :  { %333 = vst [vmem:[#allocation10 + $0xe] sm:$0x1] %v318_v2 }
 0x14d   :  { %369 = dma.vmem_to_hbm [thread:$0]  %s362_s13, 256, %s364_s16, [#allocation4], %s526_s17, %s526_s17, %s527_s18  }
 0x14e   :  { %517 = dma.done.wait [#allocation4], 256  }
 0x14f   :  { %518 = vsyncadd [#allocation4], 4294967040 }
 0x150   :  { %374 = vsyncpa [#allocation3], 1 }
 0x151   :  { %375 = vsyncpa [#allocation6], 1 }
 0x152   :  { %376 = vsyncpa [#allocation9], 1 }
 0x153   :  { %377 = vsyncpa [#allocation4], 1 }

</bundles_post_ra>
